<compile_context>
chip_gen: v7x
topology: tpu7x:2x2x1
jax: 0.10.0
libtpu: 0.0.40
codegen_flags: <defaults>
</compile_context>

<pallas_src>
import functools

import jax
import jax.numpy as jnp
import numpy as np
from jax.experimental import pallas as pl
from jax.experimental.pallas import tpu as pltpu


def _fused_conv_if_kernel(x_ref, w1_ref, w2_ref, t1_ref, t2_ref, o_ref, *, img_h):
    """Fused [conv3x3 + IF] x 2 for a block of B_blk images stacked along rows.

    x_ref : (B_blk*H, W*Cin)    bf16  input slab, W folded onto lanes
    w1_ref: (W*Cin,  3*W*Cout)  bf16  banded conv1 weights, kh taps stacked on the output axis
    w2_ref: (W*Cout, 3*W*Cout)  bf16  banded conv2 weights
    t1_ref: (1, W*Cout)         f32   IF threshold with conv1 bias folded in
    t2_ref: (1, W*Cout)         f32   IF threshold with conv2 bias folded in
    o_ref : (B_blk*H, W*Cout)   bf16  spike output (lane-dense)
    """
    rows = x_ref.shape[0]
    wco = o_ref.shape[-1]

    # Border masks: built once per grid step, shared by both stages. A row at the
    # top/bottom of an image must not receive the rolled contribution that wrapped
    # in from the neighbouring image of the stacked slab (== zero padding along H).
    h_in_img = jax.lax.broadcasted_iota(jnp.int32, (rows, 1), 0) % img_h
    not_top = h_in_img != 0
    not_bot = h_in_img != img_h - 1

    def conv3x3(a_bf16, w_ref):
        # Single lane-dense MXU matmul: the 3 kh taps sit side by side on the RHS
        # output axis, so the bf16 LHS is pushed once (no per-tap cast or LHS roll).
        # The kh row shifts are applied to the f32 result via masked sublane rolls
        # (a row permutation of the LHS commutes through the matmul).
        y = jnp.dot(a_bf16, w_ref[...], preferred_element_type=jnp.float32)
        v = y[:, wco:2 * wco]                                                # kh = 1 (centre)
        v = v + jnp.where(not_top,
                          pltpu.roll(y[:, :wco], shift=1, axis=0), 0.0)      # kh = 0 (row h-1)
        v = v + jnp.where(not_bot,
                          pltpu.roll(y[:, 2 * wco:], shift=rows - 1, axis=0), 0.0)  # kh = 2 (row h+1)
        return v

    x = x_ref[...]                                    # bf16 straight from HBM, no cast
    v1 = conv3x3(x, w1_ref)                           # (rows, W*Cout) f32 membrane
    s1 = (v1 >= t1_ref[...]).astype(jnp.bfloat16)     # IFNode1 spikes, stay in VMEM
    v2 = conv3x3(s1, w2_ref)                          # (rows, W*Cout) f32 membrane
    o_ref[...] = (v2 >= t2_ref[...]).astype(o_ref.dtype)   # IFNode2 spikes (lane-dense store)


def _banded_weights(w_hwio, W):
    """Fold kw taps + W zero-padding of a padding=1 conv into a banded matrix.

    Returns B of shape (3, W*Cin, W*Cout) with
      B[kh, p*Cin + ci, w*Cout + co] = w_hwio[kh, kw, ci, co]  where kw = p - w + 1
    (out-of-range taps are absent, i.e. zero -> zero padding along W).
    """
    KH, KW, Cin, Cout = w_hwio.shape
    p = np.arange(W)[None, :, None]      # source column
    w = np.arange(W)[None, None, :]      # output column
    kw = np.arange(KW)[:, None, None]
    sel = jnp.asarray((p == w + kw - 1).astype(np.float32))    # (KW, W, W)
    band = jnp.einsum("kpw,hkio->hpiwo", sel, w_hwio)          # (KH, W, Cin, W, Cout)
    return band.reshape(KH, W * Cin, W * Cout)


def prepare_params(w1_hwio, b1, w2_hwio, b2, W):
    """One-time preprocessing (do NOT redo per forward call):
    banded bf16 weights with the 3 kh taps stacked on the output axis, and
    bias-folded IF thresholds (spike = conv >= 1 - b)."""
    Cin, Cout = w1_hwio.shape[2], w1_hwio.shape[3]
    bw1 = _banded_weights(w1_hwio, W)                                  # (3, W*Cin,  W*Cout)
    bw2 = _banded_weights(w2_hwio, W)                                  # (3, W*Cout, W*Cout)
    bw1 = jnp.transpose(bw1, (1, 0, 2)).reshape(W * Cin, 3 * W * Cout).astype(jnp.bfloat16)
    bw2 = jnp.transpose(bw2, (1, 0, 2)).reshape(W * Cout, 3 * W * Cout).astype(jnp.bfloat16)
    t1 = jnp.tile(1.0 - b1.reshape(-1), W).reshape(1, W * Cout).astype(jnp.float32)
    t2 = jnp.tile(1.0 - b2.reshape(-1), W).reshape(1, W * Cout).astype(jnp.float32)
    return bw1, bw2, t1, t2


def _pick_batch_block(n, h, target_rows=256, max_rows=1024):
    """Largest useful batch block: a divisor of N with B_blk*H >= ~256 rows (fills
    the v6e/v7x MXU; v5e saturates at 128 anyway), capped for VMEM, while keeping
    >= 2 grid steps when N allows it so the 'parallel' axis shards across both
    v7x TensorCores."""
    divisors = [d for d in range(1, n + 1) if n % d == 0]
    cands = [d for d in divisors if n // d >= 2] or divisors
    cands = [d for d in cands if d * h <= max_rows] or [1]
    reaching = [d for d in cands if d * h >= target_rows]
    return min(reaching) if reaching else max(cands)


@jax.jit
def conv_layer_3x3_with_if(x_nchw, bw1, bw2, t1, t2):
    N, Cin, H, W = x_nchw.shape
    WCin = W * Cin
    WCo = t1.shape[-1]
    Cout = WCo // W

    B_blk = _pick_batch_block(N, H)
    grid = (N // B_blk,)
    rows_blk = B_blk * H

    # NCHW -> NHWC -> (N*H, W*Cin): channels-last with W folded onto the lane axis,
    # bf16 at the HBM boundary (halves input DMA; reference computes in bf16 anyway).
    x2d = jnp.transpose(x_nchw, (0, 2, 3, 1)).reshape(N * H, WCin).astype(jnp.bfloat16)

    out2d = pl.pallas_call(
        functools.partial(_fused_conv_if_kernel, img_h=H),
        out_shape=jax.ShapeDtypeStruct((N * H, WCo), jnp.bfloat16),
        grid=grid,
        in_specs=[
            pl.BlockSpec((rows_blk, WCin), lambda n: (n, 0)),
            pl.BlockSpec((WCin, 3 * WCo), lambda n: (0, 0)),
            pl.BlockSpec((WCo, 3 * WCo), lambda n: (0, 0)),
            pl.BlockSpec((1, WCo), lambda n: (0, 0)),
            pl.BlockSpec((1, WCo), lambda n: (0, 0)),
        ],
        out_specs=pl.BlockSpec((rows_blk, WCo), lambda n: (n, 0)),
        compiler_params=pltpu.CompilerParams(
            dimension_semantics=("parallel",),   # batch blocks shard across v7x TCs
        ),
    )(x2d, bw1, bw2, t1, t2)

    # (N*H, W*Cout) -> NCHW f32 (wrapper layout plumbing; spikes are exactly 0/1).
    out = out2d.reshape(N, H, W, Cout).transpose(0, 3, 1, 2)
    return out.astype(jnp.float32)


def _torch_like_conv_init(key, cin, cout):
    """Deterministic Conv2d-style init: U(-1/sqrt(fan_in), +1/sqrt(fan_in))."""
    kw_, kb_ = jax.random.split(key)
    fan_in = cin * 3 * 3
    bound = 1.0 / np.sqrt(fan_in)
    w = jax.random.uniform(kw_, (3, 3, cin, cout), jnp.float32, -bound, bound)
    b = jax.random.uniform(kb_, (1, cout), jnp.float32, -bound, bound)
    return w, b


def _reference(x_nchw, w1, b1, w2, b2):
    """Pure-JAX reference (lax.conv), bf16 operands + f32 accumulation to match the
    kernel's MXU dtypes; remaining differences are only f32 summation order."""
    def block(x, w, b):
        y = jax.lax.conv_general_dilated(
            x.astype(jnp.bfloat16), w.astype(jnp.bfloat16),
            window_strides=(1, 1), padding=((1, 1), (1, 1)),
            dimension_numbers=("NHWC", "HWIO", "NHWC"),
            preferred_element_type=jnp.float32)
        y = y + b.reshape(1, 1, 1, -1)
        return (y >= 1.0).astype(jnp.float32)
    x = jnp.transpose(x_nchw, (0, 2, 3, 1))
    out = block(block(x, w1, b1), w2, b2)
    return jnp.transpose(out, (0, 3, 1, 2))


if __name__ == "__main__":
    N, Cin, H, W = 8, 4, 16, 16     # small SNN-style shapes; W*Cout = 128 lanes
    Cout = 8

    key = jax.random.PRNGKey(0)
    kx, k1, k2 = jax.random.split(key, 3)
    x = jax.random.normal(kx, (N, Cin, H, W), jnp.float32)
    w1, b1 = _torch_like_conv_init(k1, Cin, Cout)
    w2, b2 = _torch_like_conv_init(k2, Cout, Cout)

    params = prepare_params(w1, b1, w2, b2, W)       # one-time, outside the per-call jit
    out = conv_layer_3x3_with_if(x, *params)
    out = jax.block_until_ready(out)
    assert out.shape == (N, Cout, H, W), out.shape
    assert out.dtype == jnp.float32

    ref = _reference(x, w1, b1, w2, b2)
    mismatch = float(jnp.mean(jnp.abs(out - ref)))
    # Allow a vanishing fraction of threshold-edge spike flips from f32 summation order
    # and the bias-folded threshold (conv >= 1-b vs conv+b >= 1).
    assert mismatch < 5e-3, f"spike mismatch fraction too high: {mismatch}"

    print("KERNEL_OK")
</pallas_src>

<mosaic_0001>
module attributes {stable_mosaic.version = 11 : i64} {
  func.func @_fused_conv_if_kernel(%arg0: i32, %arg1: memref<64x64xbf16, #tpu.memory_space<vmem>>, %arg2: memref<64x384xbf16, #tpu.memory_space<vmem>>, %arg3: memref<128x384xbf16, #tpu.memory_space<vmem>>, %arg4: memref<1x128xf32, #tpu.memory_space<vmem>>, %arg5: memref<1x128xf32, #tpu.memory_space<vmem>>, %arg6: memref<64x128xbf16, #tpu.memory_space<vmem>>) attributes {dimension_semantics = [#tpu.dimension_semantics<parallel>], iteration_bounds = array<i64: 2>, scalar_prefetch = 0 : i64, scratch_operands = 0 : i64, tpu.core_type = #tpu.core_type<tc>, window_params = [{transform_indices = @transform_0, window_bounds = array<i64: 64, 64>}, {pipeline_mode = #tpu.pipeline_mode<synchronous>, transform_indices = @transform_1, window_bounds = array<i64: 64, 384>}, {pipeline_mode = #tpu.pipeline_mode<synchronous>, transform_indices = @transform_2, window_bounds = array<i64: 128, 384>}, {pipeline_mode = #tpu.pipeline_mode<synchronous>, transform_indices = @transform_3, window_bounds = array<i64: 1, 128>}, {pipeline_mode = #tpu.pipeline_mode<synchronous>, transform_indices = @transform_4, window_bounds = array<i64: 1, 128>}, {transform_indices = @transform_5, window_bounds = array<i64: 64, 128>}]} {
    %0 = tpu.iota {dimensions = array<i32: 0>} : vector<64x1xi32>
    %c16_i32 = arith.constant 16 : i32
    %c0_i32 = arith.constant 0 : i32
    %1 = arith.cmpi eq, %c16_i32, %c0_i32 : i32
    %c1_i32 = arith.constant 1 : i32
    %2 = arith.select %1, %c1_i32, %c16_i32 : i32
    %3 = vector.broadcast %2 : i32 to vector<64x1xi32>
    %4 = arith.remsi %0, %3 : vector<64x1xi32>
    %c0_i32_0 = arith.constant 0 : i32
    %5 = vector.broadcast %c0_i32_0 : i32 to vector<64x1xi32>
    %6 = arith.cmpi ne, %4, %5 : vector<64x1xi32>
    %c0_i32_1 = arith.constant 0 : i32
    %7 = vector.broadcast %c0_i32_1 : i32 to vector<64x1xi32>
    %8 = arith.cmpi slt, %4, %7 : vector<64x1xi32>
    %c0_i32_2 = arith.constant 0 : i32
    %9 = arith.cmpi slt, %2, %c0_i32_2 : i32
    %10 = vector.broadcast %9 : i1 to vector<64x1xi1>
    %11 = vector.broadcast %10 : vector<64x1xi1> to vector<64x1xi1>
    %12 = arith.xori %8, %11 : vector<64x1xi1>
    %13 = arith.andi %12, %6 : vector<64x1xi1>
    %14 = vector.broadcast %2 : i32 to vector<64x1xi32>
    %15 = arith.addi %4, %14 : vector<64x1xi32>
    %16 = arith.select %13, %15, %4 : vector<64x1xi1>, vector<64x1xi32>
    %c0_i32_3 = arith.constant 0 : i32
    %17 = vector.broadcast %c0_i32_3 : i32 to vector<64x1xi32>
    %18 = arith.cmpi ne, %16, %17 : vector<64x1xi32>
    %c15_i32 = arith.constant 15 : i32
    %19 = vector.broadcast %c15_i32 : i32 to vector<64x1xi32>
    %20 = arith.cmpi ne, %16, %19 : vector<64x1xi32>
    %c0 = arith.constant 0 : index
    %c0_4 = arith.constant 0 : index
    %21 = vector.load %arg1[%c0, %c0_4] : memref<64x64xbf16, #tpu.memory_space<vmem>>, vector<64x64xbf16>
    %c0_5 = arith.constant 0 : index
    %c0_6 = arith.constant 0 : index
    %22 = vector.load %arg2[%c0_5, %c0_6] : memref<64x384xbf16, #tpu.memory_space<vmem>>, vector<64x384xbf16>
    %cst = arith.constant dense<0.000000e+00> : vector<64x384xf32>
    %23 = tpu.matmul %21, %22, %cst {dimension_numbers = #tpu.dot_dimension_numbers<[1], [0], [0], [1], [0, 0, 1, 1], [], []>} : vector<64x64xbf16>, vector<64x384xbf16>, vector<64x384xf32> -> vector<64x384xf32>
    %24 = vector.extract_strided_slice %23 {offsets = [0, 128], sizes = [64, 128], strides = [1, 1]} : vector<64x384xf32> to vector<64x128xf32>
    %25 = vector.extract_strided_slice %23 {offsets = [0, 0], sizes = [64, 128], strides = [1, 1]} : vector<64x384xf32> to vector<64x128xf32>
    %c1_i32_7 = arith.constant 1 : i32
    %26 = tpu.dynamic_rotate %25 by %c1_i32_7 dim 0 : vector<64x128xf32>, i32 -> vector<64x128xf32>
    %cst_8 = arith.constant 0.000000e+00 : f32
    %27 = vector.shape_cast %18 : vector<64x1xi1> to vector<64x1xi1>
    %28 = vector.broadcast %27 : vector<64x1xi1> to vector<64x128xi1>
    %29 = vector.broadcast %cst_8 : f32 to vector<64x128xf32>
    %30 = arith.select %28, %26, %29 : vector<64x128xi1>, vector<64x128xf32>
    %31 = arith.addf %24, %30 : vector<64x128xf32>
    %32 = vector.extract_strided_slice %23 {offsets = [0, 256], sizes = [64, 128], strides = [1, 1]} : vector<64x384xf32> to vector<64x128xf32>
    %c63_i32 = arith.constant 63 : i32
    %33 = tpu.dynamic_rotate %32 by %c63_i32 dim 0 : vector<64x128xf32>, i32 -> vector<64x128xf32>
    %cst_9 = arith.constant 0.000000e+00 : f32
    %34 = vector.shape_cast %20 : vector<64x1xi1> to vector<64x1xi1>
    %35 = vector.broadcast %34 : vector<64x1xi1> to vector<64x128xi1>
    %36 = vector.broadcast %cst_9 : f32 to vector<64x128xf32>
    %37 = arith.select %35, %33, %36 : vector<64x128xi1>, vector<64x128xf32>
    %38 = arith.addf %31, %37 : vector<64x128xf32>
    %c0_10 = arith.constant 0 : index
    %c0_11 = arith.constant 0 : index
    %39 = vector.load %arg4[%c0_10, %c0_11] : memref<1x128xf32, #tpu.memory_space<vmem>>, vector<1x128xf32>
    %40 = vector.broadcast %39 : vector<1x128xf32> to vector<64x128xf32>
    %41 = arith.cmpf oge, %38, %40 : vector<64x128xf32>
    %42 = arith.extui %41 : vector<64x128xi1> to vector<64x128xi32>
    %43 = arith.sitofp %42 : vector<64x128xi32> to vector<64x128xf32>
    %44 = arith.truncf %43 : vector<64x128xf32> to vector<64x128xbf16>
    %c0_12 = arith.constant 0 : index
    %c0_13 = arith.constant 0 : index
    %45 = vector.load %arg3[%c0_12, %c0_13] : memref<128x384xbf16, #tpu.memory_space<vmem>>, vector<128x384xbf16>
    %cst_14 = arith.constant dense<0.000000e+00> : vector<64x384xf32>
    %46 = tpu.matmul %44, %45, %cst_14 {dimension_numbers = #tpu.dot_dimension_numbers<[1], [0], [0], [1], [0, 0, 1, 1], [], []>} : vector<64x128xbf16>, vector<128x384xbf16>, vector<64x384xf32> -> vector<64x384xf32>
    %47 = vector.extract_strided_slice %46 {offsets = [0, 128], sizes = [64, 128], strides = [1, 1]} : vector<64x384xf32> to vector<64x128xf32>
    %48 = vector.extract_strided_slice %46 {offsets = [0, 0], sizes = [64, 128], strides = [1, 1]} : vector<64x384xf32> to vector<64x128xf32>
    %c1_i32_15 = arith.constant 1 : i32
    %49 = tpu.dynamic_rotate %48 by %c1_i32_15 dim 0 : vector<64x128xf32>, i32 -> vector<64x128xf32>
    %cst_16 = arith.constant 0.000000e+00 : f32
    %50 = vector.shape_cast %18 : vector<64x1xi1> to vector<64x1xi1>
    %51 = vector.broadcast %50 : vector<64x1xi1> to vector<64x128xi1>
    %52 = vector.broadcast %cst_16 : f32 to vector<64x128xf32>
    %53 = arith.select %51, %49, %52 : vector<64x128xi1>, vector<64x128xf32>
    %54 = arith.addf %47, %53 : vector<64x128xf32>
    %55 = vector.extract_strided_slice %46 {offsets = [0, 256], sizes = [64, 128], strides = [1, 1]} : vector<64x384xf32> to vector<64x128xf32>
    %c63_i32_17 = arith.constant 63 : i32
    %56 = tpu.dynamic_rotate %55 by %c63_i32_17 dim 0 : vector<64x128xf32>, i32 -> vector<64x128xf32>
    %cst_18 = arith.constant 0.000000e+00 : f32
    %57 = vector.shape_cast %20 : vector<64x1xi1> to vector<64x1xi1>
    %58 = vector.broadcast %57 : vector<64x1xi1> to vector<64x128xi1>
    %59 = vector.broadcast %cst_18 : f32 to vector<64x128xf32>
    %60 = arith.select %58, %56, %59 : vector<64x128xi1>, vector<64x128xf32>
    %61 = arith.addf %54, %60 : vector<64x128xf32>
    %c0_19 = arith.constant 0 : index
    %c0_20 = arith.constant 0 : index
    %62 = vector.load %arg5[%c0_19, %c0_20] : memref<1x128xf32, #tpu.memory_space<vmem>>, vector<1x128xf32>
    %63 = vector.broadcast %62 : vector<1x128xf32> to vector<64x128xf32>
    %64 = arith.cmpf oge, %61, %63 : vector<64x128xf32>
    %65 = arith.extui %64 : vector<64x128xi1> to vector<64x128xi32>
    %66 = arith.sitofp %65 : vector<64x128xi32> to vector<64x128xf32>
    %67 = arith.truncf %66 : vector<64x128xf32> to vector<64x128xbf16>
    %c0_21 = arith.constant 0 : index
    %c0_22 = arith.constant 0 : index
    %68 = vector.load %arg6[%c0_21, %c0_22] : memref<64x128xbf16, #tpu.memory_space<vmem>>, vector<64x128xbf16>
    tpu.vector_store %arg6[%c0_21, %c0_22], %67 {strides = array<i32>} : memref<64x128xbf16, #tpu.memory_space<vmem>>, vector<64x128xbf16>,
    return
  }
  func.func @transform_0(%arg0: i32) -> (i32, i32) {
    %c0_i32 = arith.constant 0 : i32
    %c0_i32_0 = arith.constant 0 : i32
    return %arg0, %c0_i32 : i32, i32
  }
  func.func @transform_1(%arg0: i32) -> (i32, i32) {
    %c0_i32 = arith.constant 0 : i32
    %c0_i32_0 = arith.constant 0 : i32
    %c0_i32_1 = arith.constant 0 : i32
    return %c0_i32, %c0_i32_0 : i32, i32
  }
  func.func @transform_2(%arg0: i32) -> (i32, i32) {
    %c0_i32 = arith.constant 0 : i32
    %c0_i32_0 = arith.constant 0 : i32
    %c0_i32_1 = arith.constant 0 : i32
    return %c0_i32, %c0_i32_0 : i32, i32
  }
  func.func @transform_3(%arg0: i32) -> (i32, i32) {
    %c0_i32 = arith.constant 0 : i32
    %c0_i32_0 = arith.constant 0 : i32
    %c0_i32_1 = arith.constant 0 : i32
    return %c0_i32, %c0_i32_0 : i32, i32
  }
  func.func @transform_4(%arg0: i32) -> (i32, i32) {
    %c0_i32 = arith.constant 0 : i32
    %c0_i32_0 = arith.constant 0 : i32
    %c0_i32_1 = arith.constant 0 : i32
    return %c0_i32, %c0_i32_0 : i32, i32
  }
  func.func @transform_5(%arg0: i32) -> (i32, i32) {
    %c0_i32 = arith.constant 0 : i32
    %c0_i32_0 = arith.constant 0 : i32
    return %arg0, %c0_i32 : i32, i32
  }
}

</mosaic_0001>

<bundles_post_ra>
// kernel: conv_layer_3x3_with_if.1
= control target key start
LH: loop header
LB: loop body
LE: loop exit
PB: predicated region body
PF: predicated region fallthrough
CT: control target
= control target key end

     0   :  { %s1519_s18 = smov 0   ;;  %s1867_s0 = inlined_call_operand.vmem [shape: bf16[128,64], index: 0, kind: input, shape index: {}]   ;;  %s1868_s1 = inlined_call_operand.vmem [shape: bf16[64,384], index: 1, kind: input, shape index: {}]   ;;  %s1869_s2 = inlined_call_operand.vmem [shape: bf16[128,384], index: 2, kind: input, shape index: {}]   ;;  %s1870_s3 = inlined_call_operand.vmem [shape: f32[1,128], index: 3, kind: input, shape index: {}]   ;;  %s1871_s4 = inlined_call_operand.vmem [shape: f32[1,128], index: 4, kind: input, shape index: {}]   ;;  %s1872_s5 = inlined_call_operand.vmem [shape: bf16[128,128], index: 5, kind: output, shape index: {}]  }
   0x1 LB: > { %s1231_s19 = sadd.s32 4294967295, %s1484_s18   ;;  %p1235_p0 = scmp.ge.s32.totalorder %s1484_s18, 1  ;;  %s1484_s18 = sphi %s1519_s18, %s15_s18  }
   0x2   : > { %p188_p1 = scmp.lt.s32.totalorder %s1484_s18, 3 }
   0x4   : > { %p189_p2 = pnand %p1235_p0, %p188_p1 }
   0x5   : > { %v1426_v0 = vld [vmem:[%s1868_s1 + $0x4] ss:$12 sps:$4 sm:$0xff] (!%p189_p2)   ;;  %s1236_s22 = sshll.u32 (!%p189_p2), %s1231_s19, 3  ;;  %v1428_v1 = vld [vmem:[%s1868_s1 + $0x8] ss:$12 sps:$4 sm:$0xff] (!%p189_p2)   ;;  %v1486_v2 = vmov (!%p189_p2), 0   ;;  %v229_v41 = vlaneseq (!%p189_p2) }
   0x6   : > { %192 = sbr.rel (%p189_p2) target bundleno = 521 (0x209), region = 40  ;;  %503 = vmatprep.mubr.bf16.mxu0 (!%p189_p2), %v1486_v2  ;;  %471 = vmatprep.subr.bf16.mxu0 (!%p189_p2), %v1426_v0  ;;  %v1429_v3 = vld [vmem:[%s1868_s1] ss:$12 sps:$4 sm:$0xff] (!%p189_p2)   ;;  %p217_p3 = scmp.lt.s32.totalorder (!%p189_p2), %s1236_s22, 15  ;;  %v1430_v4 = vld [vmem:[%s1868_s1 + $0x1c] ss:$12 sps:$4 sm:$0xff] (!%p189_p2)  }
   0x7   : > { %1375 = vmatprep.subr.bf16.mxu1 (!%p189_p2), %v1428_v1  ;;  %472 = vmatpush1.bf16.msra.mxu0 (!%p189_p2), %v1429_v3  ;;  %v1432_v5 = vld [vmem:[%s1868_s1 + $0x20] ss:$12 sps:$4 sm:$0xff] (!%p189_p2)   ;;  %v1433_v6 = vld [vmem:[%s1868_s1 + $0x18] ss:$12 sps:$4 sm:$0xff] (!%p189_p2)   ;;  %v1437_v9 = vld [vmem:[%s1868_s1 + $0x30] ss:$12 sps:$4 sm:$0xff] (!%p189_p2)  }
   0x8   : > { %1376 = vmatpush3.bf16.msra.mxu1 (!%p189_p2), %v1428_v1  ;;  %473 = vmatprep.subr.bf16.mxu0 (!%p189_p2), %v1430_v4  ;;  %v1434_v7 = vld [vmem:[%s1868_s1 + $0x34] ss:$12 sps:$4 sm:$0xff] (!%p189_p2)   ;;  %v1436_v8 = vld [vmem:[%s1868_s1 + $0x38] ss:$12 sps:$4 sm:$0xff] (!%p189_p2)   ;;  %v1440_v11 = vld [vmem:[%s1868_s1 + $0x50] ss:$12 sps:$4 sm:$0xff] (!%p189_p2)  }
   0x9   : > { %1377 = vmatprep.subr.bf16.mxu1 (!%p189_p2), %v1432_v5  ;;  %v1438_v10 = vld [vmem:[%s1868_s1 + $0x4c] ss:$12 sps:$4 sm:$0xff] (!%p189_p2)   ;;  %vm458_vm0 = vcmask (!%p189_p2), 523264   ;;  %v1441_v13 = vld [vmem:[%s1868_s1 + $0x48] ss:$12 sps:$4 sm:$0xff] (!%p189_p2)   ;;  %v1656_v42 = vshrl.u32 (!%p189_p2), %v229_v41, 7 }
   0xa   : > { %v1448_v17 = vld [vmem:[%s1869_s2 + $0x4] ss:$12 sps:$4 sm:$0xff] (!%p189_p2)   ;;  %v1446_v18 = vld [vmem:[%s1869_s2] ss:$12 sps:$4 sm:$0xff] (!%p189_p2)   ;;  %v1449_v19 = vld [vmem:[%s1869_s2 + $0x8] ss:$12 sps:$4 sm:$0xff] (!%p189_p2)  }
   0xb   : > { %474 = vmatpush1.bf16.msra.mxu0 (!%p189_p2), %v1433_v6  ;;  %v1452_v20 = vld [vmem:[%s1869_s2 + $0x1c] ss:$12 sps:$4 sm:$0xff] (!%p189_p2)   ;;  %v1450_v21 = vld [vmem:[%s1869_s2 + $0x18] ss:$12 sps:$4 sm:$0xff] (!%p189_p2)   ;;  %v1453_v22 = vld [vmem:[%s1869_s2 + $0x20] ss:$12 sps:$4 sm:$0xff] (!%p189_p2)  }
   0xc   : > { %1378 = vmatpush3.bf16.msra.mxu1 (!%p189_p2), %v1432_v5  ;;  %475 = vmatprep.subr.bf16.mxu0 (!%p189_p2), %v1434_v7  ;;  %v1456_v23 = vld [vmem:[%s1869_s2 + $0x34] ss:$12 sps:$4 sm:$0xff] (!%p189_p2)   ;;  %v1454_v24 = vld [vmem:[%s1869_s2 + $0x30] ss:$12 sps:$4 sm:$0xff] (!%p189_p2)   ;;  %v1457_v25 = vld [vmem:[%s1869_s2 + $0x38] ss:$12 sps:$4 sm:$0xff] (!%p189_p2)  }
   0xd   : > { %s1912_s22 = smov (!%p217_p3, %s1236_s22), 15  ;;  %1379 = vmatprep.subr.bf16.mxu1 %v1436_v8  ;;  %v1460_v26 = vld [vmem:[%s1869_s2 + $0x4c] ss:$12 sps:$4 sm:$0xff]   ;;  %v1458_v27 = vld [vmem:[%s1869_s2 + $0x48] ss:$12 sps:$4 sm:$0xff]   ;;  %v231_v43 = vadd.s32 8, %v1656_v42 }
   0xe   : > { %s1237_s14 = sshll.u32 %s1912_s22, 2  ;;  %v1461_v28 = vld [vmem:[%s1869_s2 + $0x50] ss:$12 sps:$4 sm:$0xff]   ;;  %v1462_v30 = vld [vmem:[%s1869_s2 + $0x60] ss:$12 sps:$4 sm:$0xff]   ;;  %v232_v49 = vadd.s32 16, %v1656_v42 }
   0xf   : > { %s220_s20 = scalar_lea.vmem %s1867_s0, %s1237_s14  ;;  %476 = vmatpush1.bf16.msra.mxu0 %v1437_v9  ;;  %v1464_v29 = vld [vmem:[%s1869_s2 + $0x64] ss:$12 sps:$4 sm:$0xff]   ;;  %v1465_v31 = vld [vmem:[%s1869_s2 + $0x68] ss:$12 sps:$4 sm:$0xff]   ;;  %v1469_v34 = vld [vmem:[%s1869_s2 + $0x80] ss:$12 sps:$4 sm:$0xff]   ;;  %s1833_s11 = scalar_lea.vmem %s1872_s5, %s1237_s14 }
  0x10   : > { %v1442_v12 = vld [vmem:[%s220_s20] sm:$0xff]   ;;  %1380 = vmatpush3.bf16.msra.mxu1 %v1436_v8  ;;  %477 = vmatprep.subr.bf16.mxu0 %v1438_v10  ;;  %v1443_v14 = vld [vmem:[%s220_s20 + $0x8] sm:$0xff]   ;;  %v1444_v15 = vld [vmem:[%s220_s20 + $0x10] sm:$0xff]   ;;  %v249_v46 = vand.u32 15, %v231_v43  ;;  %vm1874_vm1 = vcmp.lt.s32.totalorder %v1656_v42, 1  ;;  %v233_v54 = vadd.s32 24, %v1656_v42 }
  0x11   : > { %1381 = vmatprep.subr.bf16.mxu1 %v1440_v11  ;;  %1383 = vmatprep.mubr.msk.bf16.mxu1 %vm458_vm0, %v1442_v12  ;;  %v1445_v16 = vld [vmem:[%s220_s20 + $0x18] sm:$0xff]   ;;  %v1472_v35 = vld [vmem:[%s1869_s2 + $0x94] ss:$12 sps:$4 sm:$0xff]   ;;  %vm1873_vm2 = vcmp.lt.s32.totalorder %v1656_v42, 7  ;;  %v256_v63 = vand.u32 15, %v232_v49  ;;  %v234_v7 = vadd.s32 32, %v1656_v42 }
  0x12   : > { %v1468_v32 = vld [vmem:[%s1869_s2 + $0x7c] ss:$12 sps:$4 sm:$0xff]   ;;  %v1466_v33 = vld [vmem:[%s1869_s2 + $0x78] ss:$12 sps:$4 sm:$0xff]   ;;  %vm1668_vm3 = vcmp.ne.s32.totalorder %v249_v46, 15  ;;  %v263_v5 = vand.u32 15, %v233_v54 }
  0x13   : > { %478 = vmatpush1.bf16.msra.mxu0 %v1441_v13  ;;  %v1470_v36 = vld [vmem:[%s1869_s2 + $0x90] ss:$12 sps:$4 sm:$0xff]   ;;  %v1473_v37 = vld [vmem:[%s1869_s2 + $0x98] ss:$12 sps:$4 sm:$0xff]   ;;  %v1474_v39 = vld [vmem:[%s1869_s2 + $0xa8] ss:$12 sps:$4 sm:$0xff]  }
  0x14   : > { %1382 = vmatpush3.bf16.msra.mxu1 %v1440_v11  ;;  %902 = vmatprep.subr.bf16.mxu0 %v1448_v17  ;;  %v1476_v38 = vld [vmem:[%s1869_s2 + $0xac] ss:$12 sps:$4 sm:$0xff]   ;;  %v1477_v40 = vld [vmem:[%s1869_s2 + $0xb0] ss:$12 sps:$4 sm:$0xff]   ;;  %v235_v11 = vadd.s32 40, %v1656_v42  ;;  %vm1690_vm4 = vcmp.ne.s32.totalorder %v256_v63, 0 }
  0x15   : > { %1391 = vmatprep.subr.bf16.mxu1 %v1449_v19  ;;  %vm1694_vm5 = vcmp.ne.s32.totalorder %v263_v5, 15  ;;  %v236_v49 = vadd.s32 48, %v1656_v42 }
  0x16   : > { %1256 = vmatmul.mubr.msk.bf16.vlgmr.msra.gmra.mrb[0].mxu0 %vm458_vm0, %v1442_v12 }
  0x17   : > { %1384 = vmatmul.mubr.msk.bf16.vlgmr.msra.gmra.mrb[0].mxu1 %vm458_vm0, %v1443_v14  ;;  %513 = vmatprep.mubr.bf16.mxu0 %v1486_v2  ;;  %v284_v63 = vand.u32 15, %v236_v49 }
  0x18   : > { %1387 = vmatprep.mubr.msk.bf16.mxu1 %vm458_vm0, %v1444_v15  ;;  %903 = vmatpush1.bf16.msra.mxu0 %v1446_v18 }
  0x19   : > { %1392 = vmatpush3.bf16.msra.mxu1 %v1449_v19  ;;  %904 = vmatprep.subr.bf16.mxu0 %v1452_v20  ;;  %vm1742_vm11 = vcmp.ne.s32.totalorder %v284_v63, 0 }
  0x1a   : > { %1393 = vmatprep.subr.bf16.mxu1 %v1453_v22 }
  0x1c   : > { %905 = vmatpush1.bf16.msra.mxu0 %v1450_v21 }
  0x1d   : > { %1394 = vmatpush3.bf16.msra.mxu1 %v1453_v22  ;;  %906 = vmatprep.subr.bf16.mxu0 %v1456_v23 }
  0x1e   : > { %1257 = vmatmul.mubr.msk.bf16.gmra.mrb[4].mxu0 %vm458_vm0, %v1443_v14  ;;  %1395 = vmatprep.subr.bf16.mxu1 %v1457_v25 }
  0x1f   : > { %1388 = vmatmul.mubr.msk.bf16.gmra.mrb[4].mxu1 %vm458_vm0, %v1445_v16  ;;  %523 = vmatprep.mubr.bf16.mxu0 %v1486_v2 }
  0x20   : > { %907 = vmatpush1.bf16.msra.mxu0 %v1454_v24  ;;  %v270_v24 = vand.u32 15, %v234_v7 }
  0x21   : > { %1396 = vmatpush3.bf16.msra.mxu1 %v1457_v25  ;;  %908 = vmatprep.subr.bf16.mxu0 %v1460_v26 }
  0x22   : > { %1397 = vmatprep.subr.bf16.mxu1 %v1461_v28  ;;  %vm1719_vm7 = vcmp.ne.s32.totalorder %v270_v24, 0 }
  0x24   : > { %909 = vmatpush1.bf16.msra.mxu0 %v1458_v27 }
  0x25   : > { %1398 = vmatpush3.bf16.msra.mxu1 %v1461_v28  ;;  %910 = vmatprep.subr.bf16.mxu0 %v1464_v29  ;;  %v277_v29 = vand.u32 15, %v235_v11 }
  0x26   : > { %1258 = vmatmul.mubr.msk.bf16.gmra.mrb[8].mxu0 %vm458_vm0, %v1444_v15  ;;  %1399 = vmatprep.subr.bf16.mxu1 %v1465_v31 }
  0x27   : > { %533 = vmatprep.mubr.bf16.mxu0 %v1486_v2  ;;  %vm1724_vm9 = vcmp.ne.s32.totalorder %v277_v29, 15 }
  0x28   : > { %911 = vmatpush1.bf16.msra.mxu0 %v1462_v30 }
  0x29   : > { %1400 = vmatpush3.bf16.msra.mxu1 %v1465_v31  ;;  %912 = vmatprep.subr.bf16.mxu0 %v1468_v32 }
  0x2a   : > { %1401 = vmatprep.subr.bf16.mxu1 %v1469_v34 }
  0x2c   : > { %913 = vmatpush1.bf16.msra.mxu0 %v1466_v33 }
  0x2d   : > { %1402 = vmatpush3.bf16.msra.mxu1 %v1469_v34  ;;  %914 = vmatprep.subr.bf16.mxu0 %v1472_v35 }
  0x2e   : > { %1259 = vmatmul.mubr.msk.bf16.gmra.mrb[12].mxu0 %vm458_vm0, %v1445_v16  ;;  %1403 = vmatprep.subr.bf16.mxu1 %v1473_v37 }
  0x2f   : > { %934 = vmatprep.mubr.bf16.mxu0 %v1486_v2 }
  0x30   : > { %915 = vmatpush1.bf16.msra.mxu0 %v1470_v36 }
  0x31   : > { %1404 = vmatpush3.bf16.msra.mxu1 %v1473_v37  ;;  %916 = vmatprep.subr.bf16.mxu0 %v1476_v38 }
  0x32   : > { %1405 = vmatprep.subr.bf16.mxu1 %v1477_v40 }
  0x34   : > { %917 = vmatpush1.bf16.msra.mxu0 %v1474_v39 }
  0x35   : > { %1406 = vmatpush3.bf16.msra.mxu1 %v1477_v40  ;;  %v1264_v40 = vld [vmem:[%s1870_s3] ss:$0 sm:$0xff] }
  0xe9   : > { %v1659_v44 = vpop.f32.mrb[0].mxu0 }
  0xea   : > { %v1385_v45 = vpop.f32.mrb[0].mxu1  ;;  %v1661_v47 = vpop.f32.mrb[1].mxu0  ;;  %v609_v55 = vrot.slane %v1659_v44, 7  ;;  %v1487_v44 = vmov 1.0|1.0  }
  0xeb   : > { %v578_v48 = vpop.f32.mrb[1].mxu1  ;;  %v660_v50 = vrot.slane %v1385_v45, 1  ;;  %v509_v52 = vpop.f32.mrb[2].mxu0 }
  0xec   : > { %v658_v51 = vrot.slane %v578_v48, 1  ;;  %v1386_v53 = vpop.f32.mrb[2].mxu1  ;;  %v610_v56 = vrot.slane %v509_v52, 7  ;;  %v511_v58 = vpop.f32.mrb[3].mxu0 }
  0xed   : > { %v661_v57 = vrot.slane %v1386_v53, 1  ;;  %v581_v59 = vpop.f32.mrb[3].mxu1 }
  0xee   : > { %v659_v61 = vrot.slane %v581_v59, 1  ;;  %v624_v62 = vsel %vm1874_vm1, %v609_v55, %v610_v56 }
  0xef   : > { %v671_v0 = vsel %vm1873_vm2, %v660_v50, %v661_v57  ;;  %v651_v1 = vadd.f32 %v624_v62, %v511_v58  ;;  %v237_v58 = vadd.s32 56, %v1656_v42 }
  0xf0   : > { %v672_v3 = vsel %vm1873_vm2, %v659_v61, %v660_v50  ;;  %v1682_v4 = vsel %vm1873_vm2, %v658_v51, %v659_v61 }
  0xf1   : > { %v692_v6 = vsel %vm1668_vm3, %v672_v3, 0.0  ;;  %v515_v9 = vpop.f32.mrb[4].mxu0  ;;  %v242_v3 = vand.u32 15, %v1656_v42 }
  0xf2   : > { %v1687_v8 = vadd.f32 %v692_v6, %v651_v1  ;;  %v1389_v10 = vpop.f32.mrb[4].mxu1  ;;  %v611_v12 = vrot.slane %v515_v9, 7  ;;  %v517_v14 = vpop.f32.mrb[5].mxu0  ;;  %v291_v6 = vand.u32 15, %v237_v58 }
  0xf3   : > { %v594_v15 = vpop.f32.mrb[5].mxu1  ;;  %v519_v16 = vpop.f32.mrb[6].mxu0  ;;  %v664_v17 = vrot.slane %v1389_v10, 1  ;;  %vm1748_vm14 = vcmp.ne.s32.totalorder %v242_v3, 0 }
  0xf4   : > { %v662_v19 = vrot.slane %v594_v15, 1  ;;  %v1390_v20 = vpop.f32.mrb[6].mxu1  ;;  %v623_v21 = vsel %vm1874_vm1, %v610_v56, %v611_v12  ;;  %v612_v22 = vrot.slane %v519_v16, 7  ;;  %v521_v23 = vpop.f32.mrb[7].mxu0  ;;  %vm1758_vm0 = vcmp.ne.s32.totalorder %v291_v6, 15 }
  0xf5   : > { %v665_v25 = vrot.slane %v1390_v20, 1  ;;  %v597_v26 = vpop.f32.mrb[7].mxu1  ;;  %v644_v27 = vsel %vm1690_vm4, %v623_v21, 0.0 }
  0xf6   : > { %v670_v28 = vsel %vm1873_vm2, %v661_v57, %v662_v19  ;;  %v663_v30 = vrot.slane %v597_v26, 1  ;;  %v652_v31 = vadd.f32 %v644_v27, %v517_v14  ;;  %v622_v32 = vsel %vm1874_vm1, %v611_v12, %v612_v22 }
  0xf7   : > { %v694_v33 = vsel %vm1694_vm5, %v670_v28, 0.0  ;;  %v667_v34 = vsel %vm1873_vm2, %v664_v17, %v665_v25  ;;  %v653_v35 = vadd.f32 %v622_v32, %v521_v23  ;;  %v674_v38 = vsel %vm1873_vm2, %v665_v25, %v658_v51 }
  0xf8   : > { %v668_v36 = vsel %vm1873_vm2, %v663_v30, %v664_v17  ;;  %v669_v37 = vsel %vm1873_vm2, %v662_v19, %v663_v30  ;;  %v701_v39 = vadd.f32 %v671_v0, %v652_v31  ;;  %v698_v29 = vsel %vm1758_vm0, %v674_v38, 0.0 }
  0xf9   : > { %v702_v41 = vadd.f32 %v694_v33, %v653_v35  ;;  %v525_v43 = vpop.f32.mrb[8].mxu0  ;;  %v696_v62 = vsel %vm1724_vm9, %v668_v36, 0.0 }
  0xfa   : > { %vm716_vm6 = vcmp.ge.f32.partialorder %v701_v39, %v1264_v40  ;;  %v613_v45 = vrot.slane %v525_v43, 7  ;;  %v527_v48 = vpop.f32.mrb[9].mxu0 }
  0xfb   : > { %vm717_vm8 = vcmp.ge.f32.partialorder %v702_v41, %v1264_v40  ;;  %v529_v50 = vpop.f32.mrb[10].mxu0 }
  0xfc   : > { %v621_v52 = vsel %vm1874_vm1, %v612_v22, %v613_v45  ;;  %v614_v53 = vrot.slane %v529_v50, 7  ;;  %v531_v54 = vpop.f32.mrb[11].mxu0  ;;  %vm1730_vm10 = vmpackc.low %vm717_vm8, %vm716_vm6 }
  0xfd   : > { %v646_v57 = vsel %vm1719_vm7, %v621_v52, 0.0 }
  0xfe   : > { %v654_v59 = vadd.f32 %v646_v57, %v527_v48  ;;  %v620_v61 = vsel %vm1874_vm1, %v613_v45, %v614_v53 }
  0xff   : > { %v655_v0 = vadd.f32 %v620_v61, %v531_v54 }
 0x100   : > { %v703_v1 = vadd.f32 %v669_v37, %v654_v59 }
 0x101   : > { %v535_v5 = vpop.f32.mrb[12].mxu0  ;;  %v704_v7 = vadd.f32 %v696_v62, %v655_v0 }
 0x102   : > { %v615_v9 = vrot.slane %v535_v5, 7  ;;  %v537_v11 = vpop.f32.mrb[13].mxu0  ;;  %vm718_vm12 = vcmp.ge.f32.partialorder %v703_v1, %v1264_v40 }
 0x103   : > { %v539_v12 = vpop.f32.mrb[14].mxu0  ;;  %vm719_vm13 = vcmp.ge.f32.partialorder %v704_v7, %v1264_v40 }
 0x104   : > { %v619_v14 = vsel %vm1874_vm1, %v614_v53, %v615_v9  ;;  %v616_v16 = vrot.slane %v539_v12, 7  ;;  %v541_v17 = vpop.f32.mrb[15].mxu0  ;;  %vm1752_vm15 = vmpackc.low %vm719_vm13, %vm718_vm12  ;;  %vm715_vm12 = vcmp.ge.f32.partialorder %v1687_v8, %v1264_v40 }
 0x105   : > { %v648_v20 = vsel %vm1742_vm11, %v619_v14, 0.0 }
 0x106   : > { %v656_v22 = vadd.f32 %v648_v20, %v537_v11  ;;  %v625_v23 = vsel %vm1874_vm1, %v616_v16, %v609_v55  ;;  %v618_v24 = vsel %vm1874_vm1, %v615_v9, %v616_v16 }
 0x107   : > { %v642_v25 = vsel %vm1748_vm14, %v625_v23, 0.0  ;;  %v657_v26 = vadd.f32 %v618_v24, %v541_v17  ;;  %v1313_v23 = vld [vmem:[%s1871_s4] ss:$0 sm:$0xff] }
 0x108   : > { %v705_v27 = vadd.f32 %v667_v34, %v656_v22  ;;  %v650_v28 = vadd.f32 %v642_v25, %v1661_v47 }
 0x109   : > { %v706_v30 = vadd.f32 %v698_v29, %v657_v26 }
 0x10a   : > { %v699_v31 = vadd.f32 %v1682_v4, %v650_v28  ;;  %vm720_vm6 = vcmp.ge.f32.partialorder %v705_v27, %v1264_v40  ;;  %v1488_v27 = vmov 0.0  }
 0x10b   : > { %vm721_vm8 = vcmp.ge.f32.partialorder %v706_v30, %v1264_v40 }
 0x10c   : > { %vm714_vm13 = vcmp.ge.f32.partialorder %v699_v31, %v1264_v40  ;;  %vm1303_vm2 = vmpackc.low %vm721_vm8, %vm720_vm6 }
 0x10d   : > { %vm1297_vm1 = vmpackc.low %vm715_vm12, %vm714_vm13 }
 0x10e   : > { %1298 = vmatmul.mubr.msk.bf16.vlgmr.msra.gmra.mrb[16].mxu0 %vm1297_vm1, %v1487_v44  ;;  %1407 = vmatprep.mubr.msk.bf16.mxu1 %vm1297_vm1, %v1487_v44  ;;  %vm1895_vm1 = vcmp.lt.s32.totalorder %v1656_v42, 1 }
 0x10f   : > { %1408 = vmatmul.mubr.msk.bf16.vlgmr.msra.gmra.mrb[8].mxu1 %vm1730_vm10, %v1487_v44  ;;  %944 = vmatprep.mubr.bf16.mxu0 %v1486_v2  ;;  %vm1899_vm6 = vmmov %vm1895_vm1 }
 0x110   : > { %1411 = vmatprep.mubr.msk.bf16.mxu1 %vm1752_vm15, %v1487_v44 }
 0x116   : > { %1300 = vmatmul.mubr.msk.bf16.gmra.mrb[20].mxu0 %vm1730_vm10, %v1487_v44 }
 0x117   : > { %1412 = vmatmul.mubr.msk.bf16.gmra.mrb[12].mxu1 %vm1303_vm2, %v1487_v44  ;;  %954 = vmatprep.mubr.bf16.mxu0 %v1486_v2 }
 0x11e   : > { %1302 = vmatmul.mubr.msk.bf16.gmra.mrb[24].mxu0 %vm1752_vm15, %v1487_v44 }
 0x11f   : > { %964 = vmatprep.mubr.bf16.mxu0 %v1486_v2 }
 0x126   : > { %1304 = vmatmul.mubr.msk.bf16.gmra.mrb[28].mxu0 %vm1303_vm2, %v1487_v44  ;;  %vm1896_vm2 = vcmp.lt.s32.totalorder %v1656_v42, 7 }
 0x127   : > { %vm1897_vm10 = vmmov %vm1896_vm2 }
 0x128   : > { %vm1898_vm15 = vmmov %vm1896_vm2 }
 0x129   : > { %vm1901_vm8 = vmmov %vm1896_vm2 }
 0x12a   : > { %vm1902_vm12 = vmmov %vm1896_vm2 }
 0x12b   : > { %vm1904_vm13 = vmmov %vm1896_vm2 }
 0x1e1   : > { %v1786_v47 = vpop.f32.mrb[16].mxu0 }
 0x1e2   : > { %v1788_v55 = vpop.f32.mrb[17].mxu0  ;;  %v1409_v4 = vpop.f32.mrb[8].mxu1  ;;  %v1040_v33 = vrot.slane %v1786_v47, 7 }
 0x1e3   : > { %v940_v8 = vpop.f32.mrb[18].mxu0  ;;  %v1009_v32 = vpop.f32.mrb[9].mxu1  ;;  %v1074_v37 = vrot.slane %v1409_v4, 1 }
 0x1e4   : > { %v1041_v34 = vrot.slane %v940_v8, 7  ;;  %v942_v35 = vpop.f32.mrb[19].mxu0  ;;  %v1410_v36 = vpop.f32.mrb[10].mxu1  ;;  %v1072_v40 = vrot.slane %v1009_v32, 1 }
 0x1e5   : > { %v1075_v38 = vrot.slane %v1410_v36, 1  ;;  %v1012_v39 = vpop.f32.mrb[11].mxu1 }
 0x1e6   : > { %v1054_v2 = vsel %vm1895_vm1, %v1040_v33, %v1041_v34  ;;  %v1073_v41 = vrot.slane %v1012_v39, 1 }
 0x1e7   : > { %v1065_v43 = vadd.f32 %v1054_v2, %v942_v35  ;;  %v1084_v45 = vsel %vm1896_vm2, %v1074_v37, %v1075_v38 }
 0x1e8   : > { %v1085_v48 = vsel %vm1897_vm10, %v1073_v41, %v1074_v37  ;;  %v1801_v49 = vsel %vm1898_vm15, %v1072_v40, %v1073_v41 }
 0x1e9   : > { %v1089_v50 = vsel %vm1668_vm3, %v1085_v48, 0.0  ;;  %v946_v52 = vpop.f32.mrb[20].mxu0  ;;  %vm1900_vm3 = vmmov %vm1895_vm1 }
 0x1ea   : > { %v1805_v53 = vadd.f32 %v1089_v50, %v1065_v43  ;;  %v1042_v54 = vrot.slane %v946_v52, 7  ;;  %v948_v56 = vpop.f32.mrb[21].mxu0  ;;  %v1413_v57 = vpop.f32.mrb[12].mxu1  ;;  %vm1905_vm1 = vmmov %vm1896_vm2 }
 0x1eb   : > { %v950_v58 = vpop.f32.mrb[22].mxu0  ;;  %v1025_v59 = vpop.f32.mrb[13].mxu1  ;;  %v1078_v60 = vrot.slane %v1413_v57, 1  ;;  %vm1906_vm10 = vmmov %vm1900_vm3 }
 0x1ec   : > { %v1053_v61 = vsel %vm1899_vm6, %v1041_v34, %v1042_v54  ;;  %v1043_v62 = vrot.slane %v950_v58, 7  ;;  %v1076_v63 = vrot.slane %v1025_v59, 1  ;;  %v952_v0 = vpop.f32.mrb[23].mxu0  ;;  %v1414_v1 = vpop.f32.mrb[14].mxu1  ;;  %vm1907_vm15 = vmmov %vm1900_vm3 }
 0x1ed   : > { %v1058_v3 = vsel %vm1690_vm4, %v1053_v61, 0.0  ;;  %v1079_v5 = vrot.slane %v1414_v1, 1  ;;  %v1028_v6 = vpop.f32.mrb[15].mxu1  ;;  %vm1903_vm4 = vmmov %vm1896_vm2 }
 0x1ee   : > { %v1066_v7 = vadd.f32 %v1058_v3, %v948_v56  ;;  %v1052_v9 = vsel %vm1900_vm3, %v1042_v54, %v1043_v62  ;;  %v1083_v11 = vsel %vm1901_vm8, %v1075_v38, %v1076_v63  ;;  %v1077_v12 = vrot.slane %v1028_v6, 1 }
 0x1ef   : > { %v1067_v14 = vadd.f32 %v1052_v9, %v952_v0  ;;  %v1091_v16 = vsel %vm1694_vm5, %v1083_v11, 0.0  ;;  %v1080_v13 = vsel %vm1902_vm12, %v1078_v60, %v1079_v5  ;;  %v1087_v17 = vsel %vm1903_vm4, %v1079_v5, %v1072_v40 }
 0x1f0   : > { %v1098_v19 = vadd.f32 %v1084_v45, %v1066_v7  ;;  %v1081_v20 = vsel %vm1904_vm13, %v1077_v12, %v1078_v60  ;;  %v1082_v22 = vsel %vm1905_vm1, %v1076_v63, %v1077_v12  ;;  %v1095_v63 = vsel %vm1758_vm0, %v1087_v17, 0.0 }
 0x1f1   : > { %v1099_v18 = vadd.f32 %v1091_v16, %v1067_v14  ;;  %v956_v24 = vpop.f32.mrb[24].mxu0  ;;  %v1093_v38 = vsel %vm1724_vm9, %v1081_v20, 0.0 }
 0x1f2   : > { %vm1113_vm5 = vcmp.ge.f32.partialorder %v1098_v19, %v1313_v23  ;;  %v1044_v25 = vrot.slane %v956_v24, 7  ;;  %v958_v26 = vpop.f32.mrb[25].mxu0 }
 0x1f3   : > { %v1316_v28 = vsel %vm1113_vm5, 1.0, %v1488_v27  ;;  %vm1114_vm2 = vcmp.ge.f32.partialorder %v1099_v18, %v1313_v23  ;;  %v960_v29 = vpop.f32.mrb[26].mxu0 }
 0x1f4   : > { %v1317_v30 = vsel %vm1114_vm2, 1.0, %v1488_v27  ;;  %v1051_v31 = vsel %vm1906_vm10, %v1043_v62, %v1044_v25  ;;  %v1045_v44 = vrot.slane %v960_v29, 7  ;;  %v962_v4 = vpop.f32.mrb[27].mxu0 }
 0x1f5   : > { %v1344_v8 = vpack.c.bf16 %v1317_v30, %v1316_v28  ;;  %v1060_v32 = vsel %vm1719_vm7, %v1051_v31, 0.0  ;;  %vm1908_vm7 = vmmov %vm1906_vm10 }
 0x1f6   : > { %v1068_v34 = vadd.f32 %v1060_v32, %v958_v26  ;;  %v1050_v35 = vsel %vm1907_vm15, %v1044_v25, %v1045_v44  ;;  %vm1909_vm9 = vmmov %vm1908_vm7 }
 0x1f7   : > { %1352 = vst [vmem:[%s1833_s11 + $0x8] sm:$0xff] %v1344_v8   ;;  %v1069_v36 = vadd.f32 %v1050_v35, %v962_v4  ;;  %vm1910_vm8 = vmmov %vm1908_vm7 }
 0x1f8   : > { %v1100_v37 = vadd.f32 %v1082_v22, %v1068_v34 }
 0x1f9   : > { %v1101_v39 = vadd.f32 %v1093_v38, %v1069_v36  ;;  %v966_v40 = vpop.f32.mrb[28].mxu0 }
 0x1fa   : > { %vm1115_vm6 = vcmp.ge.f32.partialorder %v1100_v37, %v1313_v23  ;;  %v1046_v2 = vrot.slane %v966_v40, 7  ;;  %v968_v41 = vpop.f32.mrb[29].mxu0 }
 0x1fb   : > { %v1318_v43 = vsel %vm1115_vm6, 1.0, %v1488_v27  ;;  %vm1116_vm3 = vcmp.ge.f32.partialorder %v1101_v39, %v1313_v23  ;;  %v970_v46 = vpop.f32.mrb[30].mxu0 }
 0x1fc   : > { %v1319_v45 = vsel %vm1116_vm3, 1.0, %v1488_v27  ;;  %v1049_v48 = vsel %vm1908_vm7, %v1045_v44, %v1046_v2  ;;  %v1047_v50 = vrot.slane %v970_v46, 7  ;;  %v972_v52 = vpop.f32.mrb[31].mxu0 }
 0x1fd   : > { %v1347_v54 = vpack.c.bf16 %v1319_v45, %v1318_v43  ;;  %v1062_v51 = vsel %vm1742_vm11, %v1049_v48, 0.0  ;;  %vm1112_vm11 = vcmp.ge.f32.partialorder %v1805_v53, %v1313_v23 }
 0x1fe   : > { %v1070_v56 = vadd.f32 %v1062_v51, %v968_v41  ;;  %v1055_v57 = vsel %vm1909_vm9, %v1047_v50, %v1040_v33  ;;  %v1048_v58 = vsel %vm1910_vm8, %v1046_v2, %v1047_v50  ;;  %v1315_v0 = vsel %vm1112_vm11, 1.0, %v1488_v27 }
 0x1ff   : > { %1353 = vst [vmem:[%s1833_s11 + $0x10] sm:$0xff] %v1347_v54   ;;  %v1056_v59 = vsel %vm1748_vm14, %v1055_v57, 0.0  ;;  %v1071_v61 = vadd.f32 %v1048_v58, %v972_v52 }
 0x200   : > { %v1102_v62 = vadd.f32 %v1080_v13, %v1070_v56  ;;  %v1064_v10 = vadd.f32 %v1056_v59, %v1788_v55 }
 0x201   : > { %v1103_v47 = vadd.f32 %v1095_v63, %v1071_v61 }
 0x202   : > { %vm1117_vm12 = vcmp.ge.f32.partialorder %v1102_v62, %v1313_v23  ;;  %v1096_v42 = vadd.f32 %v1801_v49, %v1064_v10 }
 0x203   : > { %v1320_v33 = vsel %vm1117_vm12, 1.0, %v1488_v27  ;;  %vm1118_vm4 = vcmp.ge.f32.partialorder %v1103_v47, %v1313_v23 }
 0x204   : > { %vm1111_vm13 = vcmp.ge.f32.partialorder %v1096_v42, %v1313_v23  ;;  %v1321_v15 = vsel %vm1118_vm4, 1.0, %v1488_v27 }
 0x205   : > { %v1314_v1 = vsel %vm1111_vm13, 1.0, %v1488_v27  ;;  %v1350_v3 = vpack.c.bf16 %v1321_v15, %v1320_v33 }
 0x206   : > { %v1341_v60 = vpack.c.bf16 %v1315_v0, %v1314_v1 }
 0x207   : > { %1354 = vst [vmem:[%s1833_s11 + $0x18] sm:$0xff] %v1350_v3  }
 0x208   : > { %1342 = vst [vmem:[%s1833_s11] sm:$0xff] %v1341_v60  }
 0x209 PF: > { %s15_s18 = sadd.s32 1, %s1484_s18  }
 0x20a   : > { %p12_p4 = scmp.ge.s32.totalorder %s15_s18, 4  }
 0x20c   :  { %14 = sbr.rel (!%p12_p4) target bundleno = 1 (0x1), region = 70 }

</bundles_post_ra>
